<compile_context>
chip_gen: v6e
topology: v6e:2x2x1
jax: 0.10.0
libtpu: 0.0.40
codegen_flags: <defaults>
</compile_context>

<pallas_src>
import functools

import jax
import jax.numpy as jnp
from jax.experimental import pallas as pl
from jax.experimental.pallas import tpu as pltpu

STATE_SIZE = 4      # CartPole observation dim
HIDDEN = 16         # n_hidden_units
ACTION_SIZE = 2
H_PAD = 128         # hidden dim padded to full lane width

# ---- packed weight slab: (16, 128) f32, built once, DMA'd once per call ----
ROW_W1 = 0          # rows [0:STATE_SIZE) : W1 (state feature s -> hidden lanes)
ROW_B1 = 8          # row 8               : b1
ROW_W2D = 9         # row 9               : W2[:, 1] - W2[:, 0]  (layer-2 difference row)
ROW_B2D = 10        # row 10              : b2[1]   - b2[0]      (broadcast across lanes)
SLAB_ROWS = 16


def policy_kernel(x_ref, slab_ref, o_ref):
    """One batch tile: probs = softmax(relu(x @ W1 + b1) @ W2 + b2, axis=-1)."""
    x = x_ref[...]                                                    # (b_tile, STATE_SIZE)

    # Layer 1 on the VPU: 4 unrolled broadcast-multiply-adds (no MXU).
    acc = slab_ref[ROW_B1:ROW_B1 + 1, :] + x[:, 0:1] * slab_ref[ROW_W1:ROW_W1 + 1, :]
    for s in range(1, STATE_SIZE):                                    # static unroll
        acc = acc + x[:, s:s + 1] * slab_ref[ROW_W1 + s:ROW_W1 + s + 1, :]
    l1 = jnp.maximum(acc, 0.0)                                        # (b_tile, H_PAD); padded lanes = 0

    # Layer 2 via the precomputed difference row: only the logit difference
    # d = l1 . (W2[:,1]-W2[:,0]) + (b2[1]-b2[0]) is needed for a 2-way softmax.
    w2d = slab_ref[ROW_W2D:ROW_W2D + 1, :]                            # (1, H_PAD)
    d = jnp.sum(l1 * w2d, axis=-1, keepdims=True)                     # 1 VPU mul + 1 XLU lane reduce
    d = d + slab_ref[ROW_B2D:ROW_B2D + 1, 0:1]                        # (b_tile, 1)

    # Stable 2-way softmax over logits (0, d): both exps have non-positive args,
    # both probabilities get full relative precision (log-prob safe), no NaN/Inf.
    m = jnp.maximum(d, 0.0)
    e0 = jnp.exp(-m)                                                  # EUP
    e1 = jnp.exp(d - m)                                               # EUP
    inv = 1.0 / (e0 + e1)
    p0 = e0 * inv
    p1 = e1 * inv

    # Lane-dense unmasked store: full (b_tile, 128) block; wrapper slices [:B, :2].
    lane = jax.lax.broadcasted_iota(jnp.int32, o_ref.shape, 1)
    o_ref[...] = jnp.where(lane == 0, p0, jnp.where(lane == 1, p1, 0.0))


def pack_policy_params(w1, b1, w2, b2):
    """Pack W1, b1, (W2[:,1]-W2[:,0]), (b2[1]-b2[0]) into one (16, 128) f32 slab."""
    S, H = w1.shape
    A = w2.shape[1]
    assert S == STATE_SIZE and H <= H_PAD and A == ACTION_SIZE
    slab = jnp.zeros((SLAB_ROWS, H_PAD), dtype=jnp.float32)
    slab = slab.at[ROW_W1:ROW_W1 + S, :H].set(w1.astype(jnp.float32))
    slab = slab.at[ROW_B1, :H].set(b1.astype(jnp.float32))
    slab = slab.at[ROW_W2D, :H].set((w2[:, 1] - w2[:, 0]).astype(jnp.float32))
    slab = slab.at[ROW_B2D, :].set((b2[1] - b2[0]).astype(jnp.float32))
    return slab


@functools.partial(jax.jit, static_argnames=("b_tile",))
def policy_forward(state, slab, *, b_tile=8):
    """probs = softmax(relu(state @ W1 + b1) @ W2 + b2, axis=1)."""
    B, S = state.shape
    assert S == STATE_SIZE and b_tile % 8 == 0
    B_pad = ((B + b_tile - 1) // b_tile) * b_tile
    x = state.astype(jnp.float32)
    if B_pad != B:                                     # only pads when needed (static)
        x = jnp.pad(x, ((0, B_pad - B), (0, 0)))

    out = pl.pallas_call(
        policy_kernel,
        out_shape=jax.ShapeDtypeStruct((B_pad, H_PAD), jnp.float32),
        grid=(B_pad // b_tile,),
        in_specs=[
            pl.BlockSpec((b_tile, STATE_SIZE), lambda i: (i, 0)),   # streams per tile
            pl.BlockSpec((SLAB_ROWS, H_PAD), lambda i: (0, 0)),     # constant block -> one DMA
        ],
        out_specs=pl.BlockSpec((b_tile, H_PAD), lambda i: (i, 0)),  # lane-dense store
        compiler_params=pltpu.CompilerParams(
            dimension_semantics=("parallel",)),        # batch tiles shard across v7x's 2 TCs
    )(x, slab)
    # Padded rows (B..B_pad) carry junk derived from relu(b1); they are sliced off here.
    return out[:B, :ACTION_SIZE]


def xavier_uniform(key, shape):
    fan_in, fan_out = shape
    bound = jnp.sqrt(6.0 / (fan_in + fan_out))
    return jax.random.uniform(key, shape, dtype=jnp.float32, minval=-bound, maxval=bound)


if __name__ == "__main__":
    key = jax.random.PRNGKey(0)
    k_state, k_big, k_w1, k_w2 = jax.random.split(key, 4)

    # Mirror Policy.params_init: xavier weights, zero biases.
    # weights['3'] / bias['3'] exist in the module but are unused in forward().
    w1 = xavier_uniform(k_w1, (STATE_SIZE, HIDDEN))
    b1 = jnp.zeros((HIDDEN,), dtype=jnp.float32)
    w2 = xavier_uniform(k_w2, (HIDDEN, ACTION_SIZE))
    b2 = jnp.zeros((ACTION_SIZE,), dtype=jnp.float32)

    slab = pack_policy_params(w1, b1, w2, b2)          # built once, reused every call

    def reference(x):
        l1 = jnp.maximum(jnp.dot(x, w1, precision=jax.lax.Precision.HIGHEST) + b1, 0.0)
        l2 = jnp.dot(l1, w2, precision=jax.lax.Precision.HIGHEST) + b2
        return jax.nn.softmax(l2, axis=1)

    # 1) Tiny single-step call (select_action regime): batch=2, one grid step.
    state = jax.random.normal(k_state, (2, STATE_SIZE), dtype=jnp.float32)
    probs = jax.block_until_ready(policy_forward(state, slab, b_tile=8))
    assert probs.shape == (2, ACTION_SIZE)
    assert jnp.allclose(probs, reference(state), atol=1e-5, rtol=1e-5), "mismatch vs reference"
    assert jnp.allclose(jnp.sum(probs, axis=1), 1.0, atol=1e-6)

    # 2) Batched rollout states: the grid streams 128-row tiles while the 8 KiB
    #    weight slab is DMA'd once and stays VMEM-resident across grid steps.
    big_state = jax.random.normal(k_big, (256, STATE_SIZE), dtype=jnp.float32)
    big_probs = jax.block_until_ready(policy_forward(big_state, slab, b_tile=128))
    assert big_probs.shape == (256, ACTION_SIZE)
    assert jnp.allclose(big_probs, reference(big_state), atol=1e-5, rtol=1e-5), "batched mismatch"
    assert jnp.allclose(jnp.sum(big_probs, axis=1), 1.0, atol=1e-6)

    print("KERNEL_OK")
</pallas_src>

<mosaic_0001>
module attributes {stable_mosaic.version = 11 : i64} {
  func.func @policy_kernel(%arg0: i32, %arg1: memref<8x4xf32, #tpu.memory_space<vmem>>, %arg2: memref<16x128xf32, #tpu.memory_space<vmem>>, %arg3: memref<8x128xf32, #tpu.memory_space<vmem>>) attributes {dimension_semantics = [#tpu.dimension_semantics<parallel>], iteration_bounds = array<i64: 1>, scalar_prefetch = 0 : i64, scratch_operands = 0 : i64, tpu.core_type = #tpu.core_type<tc>, window_params = [{transform_indices = @transform_0, window_bounds = array<i64: 8, 4>}, {pipeline_mode = #tpu.pipeline_mode<synchronous>, transform_indices = @transform_1, window_bounds = array<i64: 16, 128>}, {transform_indices = @transform_2, window_bounds = array<i64: 8, 128>}]} {
    %c0 = arith.constant 0 : index
    %c0_0 = arith.constant 0 : index
    %0 = vector.load %arg1[%c0, %c0_0] : memref<8x4xf32, #tpu.memory_space<vmem>>, vector<8x4xf32>
    %c8 = arith.constant 8 : index
    %c0_1 = arith.constant 0 : index
    %1 = vector.load %arg2[%c8, %c0_1] : memref<16x128xf32, #tpu.memory_space<vmem>>, vector<1x128xf32>
    %2 = vector.extract_strided_slice %0 {offsets = [0, 0], sizes = [8, 1], strides = [1, 1]} : vector<8x4xf32> to vector<8x1xf32>
    %c0_2 = arith.constant 0 : index
    %c0_3 = arith.constant 0 : index
    %3 = vector.load %arg2[%c0_2, %c0_3] : memref<16x128xf32, #tpu.memory_space<vmem>>, vector<1x128xf32>
    %4 = vector.broadcast %2 : vector<8x1xf32> to vector<8x128xf32>
    %5 = vector.broadcast %3 : vector<1x128xf32> to vector<8x128xf32>
    %6 = arith.mulf %4, %5 : vector<8x128xf32>
    %7 = vector.broadcast %1 : vector<1x128xf32> to vector<8x128xf32>
    %8 = arith.addf %7, %6 : vector<8x128xf32>
    %9 = vector.extract_strided_slice %0 {offsets = [0, 1], sizes = [8, 1], strides = [1, 1]} : vector<8x4xf32> to vector<8x1xf32>
    %c1 = arith.constant 1 : index
    %c0_4 = arith.constant 0 : index
    %10 = vector.load %arg2[%c1, %c0_4] : memref<16x128xf32, #tpu.memory_space<vmem>>, vector<1x128xf32>
    %11 = vector.broadcast %9 : vector<8x1xf32> to vector<8x128xf32>
    %12 = vector.broadcast %10 : vector<1x128xf32> to vector<8x128xf32>
    %13 = arith.mulf %11, %12 : vector<8x128xf32>
    %14 = arith.addf %8, %13 : vector<8x128xf32>
    %15 = vector.extract_strided_slice %0 {offsets = [0, 2], sizes = [8, 1], strides = [1, 1]} : vector<8x4xf32> to vector<8x1xf32>
    %c2 = arith.constant 2 : index
    %c0_5 = arith.constant 0 : index
    %16 = vector.load %arg2[%c2, %c0_5] : memref<16x128xf32, #tpu.memory_space<vmem>>, vector<1x128xf32>
    %17 = vector.broadcast %15 : vector<8x1xf32> to vector<8x128xf32>
    %18 = vector.broadcast %16 : vector<1x128xf32> to vector<8x128xf32>
    %19 = arith.mulf %17, %18 : vector<8x128xf32>
    %20 = arith.addf %14, %19 : vector<8x128xf32>
    %21 = vector.extract_strided_slice %0 {offsets = [0, 3], sizes = [8, 1], strides = [1, 1]} : vector<8x4xf32> to vector<8x1xf32>
    %c3 = arith.constant 3 : index
    %c0_6 = arith.constant 0 : index
    %22 = vector.load %arg2[%c3, %c0_6] : memref<16x128xf32, #tpu.memory_space<vmem>>, vector<1x128xf32>
    %23 = vector.broadcast %21 : vector<8x1xf32> to vector<8x128xf32>
    %24 = vector.broadcast %22 : vector<1x128xf32> to vector<8x128xf32>
    %25 = arith.mulf %23, %24 : vector<8x128xf32>
    %26 = arith.addf %20, %25 : vector<8x128xf32>
    %cst = arith.constant 0.000000e+00 : f32
    %27 = vector.broadcast %cst : f32 to vector<8x128xf32>
    %28 = arith.maximumf %26, %27 : vector<8x128xf32>
    %c9 = arith.constant 9 : index
    %c0_7 = arith.constant 0 : index
    %29 = vector.load %arg2[%c9, %c0_7] : memref<16x128xf32, #tpu.memory_space<vmem>>, vector<1x128xf32>
    %30 = vector.broadcast %29 : vector<1x128xf32> to vector<8x128xf32>
    %31 = arith.mulf %28, %30 : vector<8x128xf32>
    %cst_8 = arith.constant dense<0.000000e+00> : vector<8xf32>
    %32 = vector.multi_reduction <add>, %31, %cst_8 [1] : vector<8x128xf32> to vector<8xf32>
    %33 = vector.shape_cast %32 : vector<8xf32> to vector<8x1xf32>
    %c10 = arith.constant 10 : index
    %c0_9 = arith.constant 0 : index
    %34 = vector.load %arg2[%c10, %c0_9] : memref<16x128xf32, #tpu.memory_space<vmem>>, vector<1x1xf32>
    %35 = vector.broadcast %34 : vector<1x1xf32> to vector<8x1xf32>
    %36 = arith.addf %33, %35 : vector<8x1xf32>
    %cst_10 = arith.constant 0.000000e+00 : f32
    %37 = vector.broadcast %cst_10 : f32 to vector<8x1xf32>
    %38 = arith.maximumf %36, %37 : vector<8x1xf32>
    %cst_11 = arith.constant 0.000000e+00 : f32
    %39 = vector.broadcast %cst_11 : f32 to vector<8x1xf32>
    %40 = arith.subf %39, %38 : vector<8x1xf32>
    %41 = math.exp %40 : vector<8x1xf32>
    %42 = arith.subf %36, %38 : vector<8x1xf32>
    %43 = math.exp %42 : vector<8x1xf32>
    %44 = arith.addf %41, %43 : vector<8x1xf32>
    %cst_12 = arith.constant 1.000000e+00 : f32
    %45 = vector.broadcast %cst_12 : f32 to vector<8x1xf32>
    %46 = arith.divf %45, %44 : vector<8x1xf32>
    %47 = arith.mulf %41, %46 : vector<8x1xf32>
    %48 = arith.mulf %43, %46 : vector<8x1xf32>
    %49 = tpu.iota {dimensions = array<i32: 1>} : vector<8x128xi32>
    %c0_i32 = arith.constant 0 : i32
    %50 = vector.broadcast %c0_i32 : i32 to vector<8x128xi32>
    %51 = arith.cmpi eq, %49, %50 : vector<8x128xi32>
    %c1_i32 = arith.constant 1 : i32
    %52 = vector.broadcast %c1_i32 : i32 to vector<8x128xi32>
    %53 = arith.cmpi eq, %49, %52 : vector<8x128xi32>
    %cst_13 = arith.constant 0.000000e+00 : f32
    %54 = vector.shape_cast %48 : vector<8x1xf32> to vector<8x1xf32>
    %55 = vector.broadcast %54 : vector<8x1xf32> to vector<8x128xf32>
    %56 = vector.broadcast %cst_13 : f32 to vector<8x128xf32>
    %57 = arith.select %53, %55, %56 : vector<8x128xi1>, vector<8x128xf32>
    %58 = vector.shape_cast %47 : vector<8x1xf32> to vector<8x1xf32>
    %59 = vector.broadcast %58 : vector<8x1xf32> to vector<8x128xf32>
    %60 = arith.select %51, %59, %57 : vector<8x128xi1>, vector<8x128xf32>
    %c0_14 = arith.constant 0 : index
    %c0_15 = arith.constant 0 : index
    %61 = vector.load %arg3[%c0_14, %c0_15] : memref<8x128xf32, #tpu.memory_space<vmem>>, vector<8x128xf32>
    tpu.vector_store %arg3[%c0_14, %c0_15], %60 {strides = array<i32>} : memref<8x128xf32, #tpu.memory_space<vmem>>, vector<8x128xf32>,
    return
  }
  func.func @transform_0(%arg0: i32) -> (i32, i32) {
    %c0_i32 = arith.constant 0 : i32
    %c0_i32_0 = arith.constant 0 : i32
    return %arg0, %c0_i32 : i32, i32
  }
  func.func @transform_1(%arg0: i32) -> (i32, i32) {
    %c0_i32 = arith.constant 0 : i32
    %c0_i32_0 = arith.constant 0 : i32
    %c0_i32_1 = arith.constant 0 : i32
    return %c0_i32, %c0_i32_0 : i32, i32
  }
  func.func @transform_2(%arg0: i32) -> (i32, i32) {
    %c0_i32 = arith.constant 0 : i32
    %c0_i32_0 = arith.constant 0 : i32
    return %arg0, %c0_i32 : i32, i32
  }
}

</mosaic_0001>

<bundles_post_ra>
// kernel: policy_forward.1
= control target key start
LH: loop header
LB: loop body
LE: loop exit
PB: predicated region body
PF: predicated region fallthrough
CT: control target
= control target key end

     0   :  { %7 = vsyncpa [#allocation3], 0  ;;  %s172_s9 = smov [#allocation2]   ;;  %s203_s0 = inlined_call_operand.vmem [shape: f32[8,4], index: 0, kind: input, shape index: {}]   ;;  %s204_s1 = inlined_call_operand.hbm [shape: f32[16,128], index: 1, kind: input, shape index: {}]   ;;  %s205_s2 = inlined_call_operand.vmem [shape: f32[8,128], index: 2, kind: output, shape index: {}]  }
   0x1   :  { %s15_s10 = sshll.u32 %s172_s9, 4  ;;  %s16_s10 = int_to_ptr.vmem [resolvable:$true] %s15_s10 }
   0x2   :  { %s158_s11 = scalar_lea.vmem %s16_s10, 256  ;;  %p163_p1 = scmp.lt.s32.totalorder %s16_s10, %s16_s10 }
   0x3   :  { %p159_p0 = scmp.ne.s32.totalorder %s16_s10, %s158_s11  ;;  %p164_p2 = scmp.lt.s32.totalorder %s158_s11, %s158_s11 }
   0x5   :  { %p165_p3 = por %p164_p2, %p163_p1 }
   0x7   :  { %p166_p4 = pnand %p165_p3, %p159_p0 }
   0x9   :  { %169 = shalt.err (!%p166_p4)
}
   0xa   :  { %s173_s12 = smov 128   ;;  %s174_s13 = smov 8  }
   0xb   :  { %21 = dma.hbm_to_vmem [thread:$0]  %s204_s1, 256, %s16_s10, [#allocation3], %s173_s12, %s173_s12, %s174_s13  }
   0xc   :  { %170 = dma.done.wait [#allocation3], 256  }
   0xd   :  { %171 = vsyncadd [#allocation3], 4294967040  ;;  %v175_v0 = vmov 0   ;;  %v176_v1 = vmov 2   ;;  %v25_v2 = vld [vmem:[%s203_s0] sm:$0xff]  ;;  %v177_v3 = vmov 1   ;;  %v103_v39 = vlaneseq }
   0xe   :  { %139 = vset.pattern.permute.xlu0 %v175_v0  ;;  %141 = vset.pattern.permute.xlu1 %v176_v1  ;;  %v178_v4 = vmov 3   ;;  %v125_v5 = vld [vmem:[#allocation2] ss:$0 sm:$0xff]  ;;  %v126_v9 = vld [vmem:[#allocation2 + $0x8] ss:$0 sm:$0xff] }
   0xf   :  { %30 = vperm.xlu0 %139, %v25_v2   ;;  %56 = vperm.xlu1 %141, %v25_v2   ;;  %v127_v10 = vld [vmem:[#allocation2 + $0x1] ss:$0 sm:$0xff]  ;;  %v128_v11 = vld [vmem:[#allocation2 + $0x2] ss:$0 sm:$0xff]  ;;  %v129_v13 = vld [vmem:[#allocation2 + $0x3] ss:$0 sm:$0xff] }
  0x10   :  { %v130_v22 = vld [vmem:[#allocation2 + $0x9] ss:$0 sm:$0xff]  ;;  %v131_v25 = vld [vmem:[#allocation2 + $0xa] ss:$0 sm:$0xff]  ;;  %v104_v40 = vand.u32 127, %v103_v39 }
  0x12   :  { %vm106_vm0 = vcmp.eq.s32.totalorder %v104_v40, 1  ;;  %vm105_vm1 = vcmp.eq.s32.totalorder %v104_v40, 0 }
  0x13   :  { %140 = vset.pattern.permute.xlu0 %v177_v3  ;;  %142 = vset.pattern.permute.xlu1 %v178_v4 }
  0x14   :  { %45 = vperm.xlu0 %140, %v25_v2   ;;  %67 = vperm.xlu1 %142, %v25_v2  }
  0x18   :  { %143 = vset.pattern.permute.xlu0 %v175_v0 }
  0x8a   :  { %v31_v6 = vpop.permute.xlu0 %30  ;;  %v57_v7 = vpop.permute.xlu1 %56 }
  0x8b   :  { %v37_v8 = vmul.f32 %v125_v5, %v31_v6  ;;  %v63_v17 = vmul.f32 %v128_v11, %v57_v7 }
  0x8d   :  { %v42_v15 = vadd.f32 %v126_v9, %v37_v8 }
  0x8f   :  { %v46_v12 = vpop.permute.xlu0 %45  ;;  %v68_v14 = vpop.permute.xlu1 %67 }
  0x90   :  { %v52_v16 = vmul.f32 %v127_v10, %v46_v12  ;;  %v74_v19 = vmul.f32 %v129_v13, %v68_v14 }
  0x92   :  { %v53_v18 = vadd.f32 %v52_v16, %v42_v15 }
  0x94   :  { %v64_v20 = vadd.f32 %v63_v17, %v53_v18 }
  0x96   :  { %v75_v21 = vadd.f32 %v74_v19, %v64_v20 }
  0x98   :  { %v76_v23 = vmax.f32 %v75_v21, 0.0 }
  0x9a   :  { %v82_v24 = vmul.f32 %v130_v22, %v76_v23 }
  0x9c   :  { %83 = vadd.xlane.f32.xlu1 %v82_v24 }
 0x125   :  { %v84_v26 = vpop.xlane.xlu1 %83 }
 0x126   :  { %v90_v27 = vadd.f32 %v131_v25, %v84_v26 }
 0x128   :  { %v91_v28 = vmax.f32 %v90_v27, 0.0 }
 0x12a   :  { %v92_v29 = vsub.f32 0.0, %v91_v28  ;;  %v95_v30 = vsub.f32 %v90_v27, %v91_v28 }
 0x12c   :  { %v93_v31 = vmul.f32 1.442695, %v92_v29  ;;  %v96_v32 = vmul.f32 1.442695, %v95_v30 }
 0x12e   :  { %144 = vpow2.f32 %v93_v31 }
 0x12f   :  { %146 = vpow2.f32 %v96_v32 }
 0x13b   :  { %v145_v33 = vpop.eup %144 }
 0x13c   :  { %v147_v34 = vpop.eup %146 }
 0x13d   :  { %v98_v35 = vadd.f32 %v147_v34, %v145_v33 }
 0x13f   :  { %148 = vrcp.f32 %v98_v35 }
 0x14c   :  { %v149_v36 = vpop.eup %148 }
 0x14d   :  { %v102_v37 = vmul.f32 %v149_v36, %v147_v34  ;;  %v101_v38 = vmul.f32 %v149_v36, %v145_v33 }
 0x14f   :  { %109 = vperm.xlu0 %143, %v102_v37  }
 0x153   :  { %115 = vperm.xlu0 %143, %v101_v38  }
 0x1ca   :  { %v110_v41 = vpop.permute.xlu0 %109 }
 0x1cb   :  { %v112_v42 = vsel %vm106_vm0, %v110_v41, 0.0 }
 0x1ce   :  { %v116_v43 = vpop.permute.xlu0 %115 }
 0x1cf   :  { %v118_v44 = vsel %vm105_vm1, %v116_v43, %v112_v42 }
 0x1d0   :  { %119 = vst [vmem:[%s205_s2] sm:$0xff] %v118_v44 }
 0x1d1   :  { %124 = vsyncpa [#allocation3], 1 }

</bundles_post_ra>
